<compile_context>
chip_gen: v7x
topology: tpu7x:2x2x1
jax: 0.10.0
libtpu: 0.0.40
codegen_flags: <defaults>
</compile_context>

<pallas_src>
import functools
import math

import jax
import jax.numpy as jnp
from jax import lax
from jax.experimental import pallas as pl
from jax.experimental.pallas import tpu as pltpu


def _pick_tile(dim: int, target: int) -> int:
    """Largest of min(target, dim) that evenly divides dim (else full dim)."""
    t = min(target, dim)
    return t if dim % t == 0 else dim
    # TODO(synk): support ragged trailing tiles instead of the full-dim fallback.


# ---------------------------------------------------------------------------
# Tiled GEMM + bias (used for in_proj and out_proj).
# ---------------------------------------------------------------------------
def _gemm_bias_kernel(a_ref, b_ref, bias_ref, o_ref, acc_ref):
    @pl.when(pl.program_id(2) == 0)
    def _():
        acc_ref[...] = jnp.zeros_like(acc_ref)

    acc_ref[...] += jnp.dot(a_ref[...], b_ref[...],
                            preferred_element_type=jnp.float32)

    @pl.when(pl.program_id(2) == pl.num_programs(2) - 1)
    def _():
        o_ref[...] = (acc_ref[...] + bias_ref[...]).astype(o_ref.dtype)


def _gemm_bias(a, b, bias, *, tm=256, tn=256, tk=256, out_dtype=None):
    """a: (M, K), b: (K, N), bias: (N,) -> a @ b + bias, shape (M, N)."""
    M, K = a.shape
    K2, N = b.shape
    assert K == K2
    out_dtype = out_dtype or a.dtype
    tm = _pick_tile(M, tm)
    tn = _pick_tile(N, tn)
    tk = _pick_tile(K, tk)
    bias2d = bias.reshape(1, N)

    cost = pl.CostEstimate(
        flops=int(2 * M * N * K),
        transcendentals=0,
        bytes_accessed=int((M * K * (N // tn) + K * N * (M // tm) + M * N)
                           * a.dtype.itemsize),
    )
    return pl.pallas_call(
        _gemm_bias_kernel,
        out_shape=jax.ShapeDtypeStruct((M, N), out_dtype),
        grid_spec=pltpu.PrefetchScalarGridSpec(
            num_scalar_prefetch=0,
            grid=(M // tm, N // tn, K // tk),
            in_specs=[
                pl.BlockSpec((tm, tk), lambda i, j, k: (i, k)),
                pl.BlockSpec((tk, tn), lambda i, j, k: (k, j)),
                pl.BlockSpec((1, tn), lambda i, j, k: (0, j)),
            ],
            out_specs=pl.BlockSpec((tm, tn), lambda i, j, k: (i, j)),
            scratch_shapes=[pltpu.VMEM((tm, tn), jnp.float32)],
        ),
        compiler_params=pltpu.CompilerParams(
            dimension_semantics=("parallel", "parallel", "arbitrary")),
        cost_estimate=cost,
    )(a, b, bias2d)


# ---------------------------------------------------------------------------
# Flash attention over pre-projected (B, H, S, dh) Q/K/V.
# ---------------------------------------------------------------------------
def _flash_attention_kernel(q_ref, k_ref, v_ref, o_ref,
                            m_scr, l_scr, acc_scr, *, causal, tq, tk):
    qi = pl.program_id(2)
    ki = pl.program_id(3)
    n_k = pl.num_programs(3)

    if causal:
        # Last KV tile containing any visible key for this q tile.
        last_k = (qi * tq + tq - 1) // tk
        run_tile = ki <= last_k          # skip fully-future tiles
        is_last = ki == last_k
    else:
        run_tile = None
        is_last = ki == n_k - 1

    def body():
        @pl.when(ki == 0)
        def _():
            m_scr[...] = jnp.full_like(m_scr, -jnp.inf)
            l_scr[...] = jnp.zeros_like(l_scr)
            acc_scr[...] = jnp.zeros_like(acc_scr)

        q = q_ref[0, 0]          # (tq, dh), native dtype (scale folded into Wq)
        k = k_ref[0, 0]          # (tk, dh)
        v = v_ref[0, 0]          # (tk, dh)

        # q @ k^T contracting the head dims directly (no transpose / XLU).
        s = lax.dot_general(q, k, (((1,), (1,)), ((), ())),
                            preferred_element_type=jnp.float32)      # (tq, tk)

        if causal:
            # TODO(synk): skip this mask for tiles strictly below the diagonal
            # (needs lax.cond or a scratch-staged select).
            row = qi * tq + lax.broadcasted_iota(jnp.int32, (tq, tk), 0)
            col = ki * tk + lax.broadcasted_iota(jnp.int32, (tq, tk), 1)
            s = jnp.where(col > row, -jnp.inf, s)

        # Online softmax update (f32 stats only).
        m_prev = m_scr[...]
        m_new = jnp.maximum(m_prev, jnp.max(s, axis=-1, keepdims=True))
        alpha = jnp.exp(m_prev - m_new)
        p = jnp.exp(s - m_new)
        l_scr[...] = alpha * l_scr[...] + jnp.sum(p, axis=-1, keepdims=True)
        acc_scr[...] = alpha * acc_scr[...] + lax.dot_general(
            p.astype(v.dtype), v, (((1,), (0,)), ((), ())),
            preferred_element_type=jnp.float32)
        m_scr[...] = m_new

        @pl.when(is_last)
        def _():
            l = l_scr[...]
            inv_l = pl.reciprocal(l, approx=True)        # EUP slot
            inv_l = inv_l * (2.0 - l * inv_l)            # Newton -> ~f32 accuracy
            o_ref[0, 0] = (acc_scr[...] * inv_l).astype(o_ref.dtype)

    if causal:
        pl.when(run_tile)(body)
    else:
        body()


def _flash_attention(q, k, v, *, causal, block_q, block_k):
    """q, k, v: (B, H, S, dh) -> (B, H, S, dh). 1/sqrt(dh) already folded in q."""
    B, H, S, dh = q.shape
    tq = _pick_tile(S, block_q)
    tk = _pick_tile(S, block_k)
    n_q = S // tq
    n_k = S // tk

    kernel = functools.partial(_flash_attention_kernel,
                               causal=causal, tq=tq, tk=tk)
    attn_factor = 0.5 if causal else 1.0
    cost = pl.CostEstimate(
        flops=int(attn_factor * 4 * B * H * S * S * dh),
        transcendentals=int(attn_factor * B * H * S * S),
        bytes_accessed=int((B * H * S * dh) * q.dtype.itemsize * (2 + 2 * n_q)),
    )

    q_spec = pl.BlockSpec((1, 1, tq, dh), lambda b, h, qi, ki: (b, h, qi, 0))
    # TODO(synk): pipeline_mode=pl.Buffered(3) on the K/V specs if xprof shows
    # exposed DMA on the KV stream; the (tk, dh) blocks make it nearly free.
    kv_spec = pl.BlockSpec((1, 1, tk, dh), lambda b, h, qi, ki: (b, h, ki, 0))

    return pl.pallas_call(
        kernel,
        out_shape=jax.ShapeDtypeStruct((B, H, S, dh), q.dtype),
        grid_spec=pltpu.PrefetchScalarGridSpec(
            num_scalar_prefetch=0,
            grid=(B, H, n_q, n_k),
            in_specs=[q_spec, kv_spec, kv_spec],
            out_specs=pl.BlockSpec((1, 1, tq, dh),
                                   lambda b, h, qi, ki: (b, h, qi, 0)),
            scratch_shapes=[
                pltpu.VMEM((tq, 1), jnp.float32),    # m (running max)
                pltpu.VMEM((tq, 1), jnp.float32),    # l (running denom)
                pltpu.VMEM((tq, dh), jnp.float32),   # acc (running PV)
            ],
        ),
        compiler_params=pltpu.CompilerParams(
            dimension_semantics=("parallel", "parallel", "parallel",
                                 "arbitrary")),
        cost_estimate=cost,
    )(q, k, v)


# ---------------------------------------------------------------------------
# Full SelfAttention forward.
# ---------------------------------------------------------------------------
def self_attention(x, w_in, b_in, w_out, b_out, *, n_heads: int,
                   causal_mask: bool = False, block_q: int = 256,
                   block_k: int = 256):
    """x: (B, S, D). w_in: (3D, D), b_in: (3D,), w_out: (D, D), b_out: (D,)."""
    B, S, D = x.shape
    assert D % n_heads == 0, "d_embed must be divisible by n_heads"
    dh = D // n_heads
    scale = 1.0 / math.sqrt(dh)

    # Fold 1/sqrt(d_head) into the Q slice of the in-projection (weights only).
    w_in_t = w_in.T.astype(x.dtype)                                    # (D, 3D)
    w_in_t = jnp.concatenate([w_in_t[:, :D] * scale, w_in_t[:, D:]], axis=1)
    b_in_s = jnp.concatenate([b_in[:D] * scale, b_in[D:]]).astype(x.dtype)

    # 1) QKV projection: one full-size Pallas GEMM (run once, not per tile).
    qkv = _gemm_bias(x.reshape(B * S, D), w_in_t, b_in_s)              # (B*S, 3D)

    def split_heads(t):
        return t.reshape(B, S, n_heads, dh).transpose(0, 2, 1, 3)      # (B,H,S,dh)

    # TODO(synk): zero-pad dh to a multiple of 128 (or group heads per grid
    # step) to improve MXU/lane fill for SD head dims 40/80/160.
    q = split_heads(qkv[:, 0 * D:1 * D])
    k = split_heads(qkv[:, 1 * D:2 * D])
    v = split_heads(qkv[:, 2 * D:3 * D])

    # 2) Flash attention over pre-projected heads.
    o = _flash_attention(q, k, v, causal=causal_mask,
                         block_q=block_q, block_k=block_k)             # (B,H,S,dh)

    # 3) Output projection: single (B*S, D) x (D, D) GEMM (full MXU contraction
    #    instead of per-head K=dh dots).
    o = o.transpose(0, 2, 1, 3).reshape(B * S, D)
    out = _gemm_bias(o, w_out.T.astype(x.dtype), b_out.astype(x.dtype))
    return out.reshape(B, S, D)


# ---------------------------------------------------------------------------
# Reference + self-test.
# ---------------------------------------------------------------------------
def _reference(x, w_in, b_in, w_out, b_out, n_heads, causal_mask=False):
    B, S, D = x.shape
    d_head = D // n_heads
    qkv = x @ w_in.T + b_in
    q, k, v = jnp.split(qkv, 3, axis=-1)
    q = q.reshape(B, S, n_heads, d_head).transpose(0, 2, 1, 3)
    k = k.reshape(B, S, n_heads, d_head).transpose(0, 2, 1, 3)
    v = v.reshape(B, S, n_heads, d_head).transpose(0, 2, 1, 3)
    w = jnp.einsum("bhqd,bhkd->bhqk", q, k)
    if causal_mask:
        mask = jnp.triu(jnp.ones((S, S), dtype=bool), 1)
        w = jnp.where(mask, -jnp.inf, w)
    w = w / math.sqrt(d_head)
    w = jax.nn.softmax(w, axis=-1)
    o = jnp.einsum("bhqk,bhkd->bhqd", w, v)
    o = o.transpose(0, 2, 1, 3).reshape(B, S, D)
    return o @ w_out.T + b_out


if __name__ == "__main__":
    def run_case(B, S, D, H, dtype, causal, block_q, block_k, tol):
        key = jax.random.PRNGKey(0)
        kx, k1, k2, k3, k4 = jax.random.split(key, 5)
        x = jax.random.normal(kx, (B, S, D), dtype=jnp.float32)
        w_in = jax.random.normal(k1, (3 * D, D), dtype=jnp.float32) * 0.1
        b_in = jax.random.normal(k2, (3 * D,), dtype=jnp.float32) * 0.1
        w_out = jax.random.normal(k3, (D, D), dtype=jnp.float32) * 0.1
        b_out = jax.random.normal(k4, (D,), dtype=jnp.float32) * 0.1

        out = self_attention(x.astype(dtype), w_in.astype(dtype),
                             b_in.astype(dtype), w_out.astype(dtype),
                             b_out.astype(dtype), n_heads=H,
                             causal_mask=causal,
                             block_q=block_q, block_k=block_k)
        out = jax.block_until_ready(out)
        assert out.shape == (B, S, D)
        ref = _reference(x, w_in, b_in, w_out, b_out, H, causal_mask=causal)
        err = float(jnp.max(jnp.abs(out.astype(jnp.float32) - ref)))
        assert err < tol, f"max err {err} >= {tol} ({dtype}, causal={causal})"

    # Small shape implied by the module spec (single tile per axis).
    for causal in (False, True):
        run_case(2, 8, 32, 4, jnp.float32, causal, 256, 256, 2e-3)

    # Multi-tile online softmax + causal tile-skip path, f32 and bf16.
    for causal in (False, True):
        run_case(2, 256, 64, 4, jnp.float32, causal, 128, 128, 2e-3)
        run_case(2, 256, 64, 4, jnp.bfloat16, causal, 128, 128, 1.5e-1)

    print("KERNEL_OK")
</pallas_src>

<mosaic_0001>
module attributes {stable_mosaic.version = 11 : i64} {
  func.func @_gemm_bias_kernel(%arg0: i32, %arg1: i32, %arg2: i32, %arg3: memref<16x32xf32, #tpu.memory_space<vmem>>, %arg4: memref<32x96xf32, #tpu.memory_space<vmem>>, %arg5: memref<1x96xf32, #tpu.memory_space<vmem>>, %arg6: memref<16x96xf32, #tpu.memory_space<vmem>>, %arg7: memref<16x96xf32, #tpu.memory_space<vmem>>) attributes {dimension_semantics = [#tpu.dimension_semantics<parallel>, #tpu.dimension_semantics<parallel>, #tpu.dimension_semantics<arbitrary>], iteration_bounds = array<i64: 1, 1, 1>, scalar_prefetch = 0 : i64, scratch_operands = 1 : i64, tpu.core_type = #tpu.core_type<tc>, window_params = [{transform_indices = @transform_0, window_bounds = array<i64: 16, 32>}, {transform_indices = @transform_1, window_bounds = array<i64: 32, 96>}, {transform_indices = @transform_2, window_bounds = array<i64: 1, 96>}, {transform_indices = @transform_3, window_bounds = array<i64: 16, 96>}]} {
    %c0_i32 = arith.constant 0 : i32
    %0 = arith.cmpi eq, %arg2, %c0_i32 : i32
    %1 = arith.extui %0 : i1 to i32
    %c0_i32_0 = arith.constant 0 : i32
    %2 = arith.cmpi ne, %1, %c0_i32_0 : i32
    scf.if %2 {
      %cst_10 = arith.constant 0.000000e+00 : f32
      %12 = vector.broadcast %cst_10 : f32 to vector<16x96xf32>
      %c0_11 = arith.constant 0 : index
      %c0_12 = arith.constant 0 : index
      %13 = vector.load %arg7[%c0_11, %c0_12] : memref<16x96xf32, #tpu.memory_space<vmem>>, vector<16x96xf32>
      tpu.vector_store %arg7[%c0_11, %c0_12], %12 {strides = array<i32>} : memref<16x96xf32, #tpu.memory_space<vmem>>, vector<16x96xf32>,
    } else {
    }
    %c0 = arith.constant 0 : index
    %c0_1 = arith.constant 0 : index
    %3 = vector.load %arg7[%c0, %c0_1] : memref<16x96xf32, #tpu.memory_space<vmem>>, vector<16x96xf32>
    %c0_2 = arith.constant 0 : index
    %c0_3 = arith.constant 0 : index
    %4 = vector.load %arg3[%c0_2, %c0_3] : memref<16x32xf32, #tpu.memory_space<vmem>>, vector<16x32xf32>
    %c0_4 = arith.constant 0 : index
    %c0_5 = arith.constant 0 : index
    %5 = vector.load %arg4[%c0_4, %c0_5] : memref<32x96xf32, #tpu.memory_space<vmem>>, vector<32x96xf32>
    %cst = arith.constant dense<0.000000e+00> : vector<16x96xf32>
    %6 = tpu.matmul %4, %5, %cst {dimension_numbers = #tpu.dot_dimension_numbers<[1], [0], [0], [1], [0, 0, 1, 1], [], []>} : vector<16x32xf32>, vector<32x96xf32>, vector<16x96xf32> -> vector<16x96xf32>
    %7 = arith.addf %3, %6 : vector<16x96xf32>
    %c0_6 = arith.constant 0 : index
    %c0_7 = arith.constant 0 : index
    %8 = vector.load %arg7[%c0_6, %c0_7] : memref<16x96xf32, #tpu.memory_space<vmem>>, vector<16x96xf32>
    tpu.vector_store %arg7[%c0_6, %c0_7], %7 {strides = array<i32>} : memref<16x96xf32, #tpu.memory_space<vmem>>, vector<16x96xf32>,
    %c0_i32_8 = arith.constant 0 : i32
    %9 = arith.cmpi eq, %arg2, %c0_i32_8 : i32
    %10 = arith.extui %9 : i1 to i32
    %c0_i32_9 = arith.constant 0 : i32
    %11 = arith.cmpi ne, %10, %c0_i32_9 : i32
    scf.if %11 {
      %c0_10 = arith.constant 0 : index
      %c0_11 = arith.constant 0 : index
      %12 = vector.load %arg7[%c0_10, %c0_11] : memref<16x96xf32, #tpu.memory_space<vmem>>, vector<16x96xf32>
      %c0_12 = arith.constant 0 : index
      %c0_13 = arith.constant 0 : index
      %13 = vector.load %arg5[%c0_12, %c0_13] : memref<1x96xf32, #tpu.memory_space<vmem>>, vector<1x96xf32>
      %14 = vector.broadcast %13 : vector<1x96xf32> to vector<16x96xf32>
      %15 = arith.addf %12, %14 : vector<16x96xf32>
      %c0_14 = arith.constant 0 : index
      %c0_15 = arith.constant 0 : index
      %16 = vector.load %arg6[%c0_14, %c0_15] : memref<16x96xf32, #tpu.memory_space<vmem>>, vector<16x96xf32>
      tpu.vector_store %arg6[%c0_14, %c0_15], %15 {strides = array<i32>} : memref<16x96xf32, #tpu.memory_space<vmem>>, vector<16x96xf32>,
    } else {
    }
    return
  }
  func.func @transform_0(%arg0: i32, %arg1: i32, %arg2: i32) -> (i32, i32) {
    %c0_i32 = arith.constant 0 : i32
    return %arg0, %arg2 : i32, i32
  }
  func.func @transform_1(%arg0: i32, %arg1: i32, %arg2: i32) -> (i32, i32) {
    %c0_i32 = arith.constant 0 : i32
    return %arg2, %arg1 : i32, i32
  }
  func.func @transform_2(%arg0: i32, %arg1: i32, %arg2: i32) -> (i32, i32) {
    %c0_i32 = arith.constant 0 : i32
    %c0_i32_0 = arith.constant 0 : i32
    return %c0_i32, %arg1 : i32, i32
  }
  func.func @transform_3(%arg0: i32, %arg1: i32, %arg2: i32) -> (i32, i32) {
    %c0_i32 = arith.constant 0 : i32
    return %arg0, %arg1 : i32, i32
  }
}

</mosaic_0001>

<bundles_post_ra>
// kernel: tpu_custom_call.1
= control target key start
LH: loop header
LB: loop body
LE: loop exit
PB: predicated region body
PF: predicated region fallthrough
CT: control target
= control target key end

     0   :  { %8 = vsyncpa [#allocation4], 0  ;;  %s365_s0 = inlined_call_operand.hbm [shape: f32[16,32], index: 0, kind: input, shape index: {}]   ;;  %s366_s1 = inlined_call_operand.hbm [shape: f32[32,96], index: 1, kind: input, shape index: {}]   ;;  %s367_s2 = inlined_call_operand.vmem [shape: f32[1,96], index: 2, kind: input, shape index: {}]   ;;  %s368_s3 = inlined_call_operand.hbm [shape: f32[16,96], index: 3, kind: output, shape index: {}]  }
   0x1   :  { %9 = vsyncpa [#allocation7], 0 }
   0x2   :  { %10 = vsyncpa [#allocation5], 0  ;;  %s285_s12 = smov [#allocation3]   ;;  %s213_s16 = scalar_lea.hbm %s365_s0, 256 }
   0x3   :  { %s16_s13 = sshll.u32 %s285_s12, 4  ;;  %p214_p0 = scmp.ne.s32.totalorder %s365_s0, %s213_s16  ;;  %s17_s13 = int_to_ptr.vmem [resolvable:$true] %s16_s13 }
   0x4   :  { %p217_p1 = scmp.lt.u32.totalorder %s213_s16, %s365_s0 }
   0x6   :  { %p219_p2 = pnand %p217_p1, %p214_p0 }
   0x8   :  { %222 = shalt.err (!%p219_p2)
}
   0x9   :  { %s223_s21 = scalar_lea.vmem %s17_s13, 256  ;;  %p228_p4 = scmp.lt.s32.totalorder %s17_s13, %s17_s13 }
   0xa   :  { %p224_p3 = scmp.ne.s32.totalorder %s17_s13, %s223_s21  ;;  %p229_p5 = scmp.lt.s32.totalorder %s223_s21, %s223_s21 }
   0xc   :  { %p230_p6 = por %p229_p5, %p228_p4 }
   0xe   :  { %p231_p7 = pnand %p230_p6, %p224_p3 }
  0x10   :  { %234 = shalt.err (!%p231_p7)
}
  0x11   :  { %s286_s22 = smov 128   ;;  %s287_s23 = smov 8  }
  0x12   :  { %22 = dma.hbm_to_vmem [thread:$0]  %s365_s0, 256, %s17_s13, [#allocation4], %s286_s22, %s286_s22, %s287_s23  }
  0x13   :  { %s288_s26 = smov [#allocation6]   ;;  %s235_s30 = scalar_lea.hbm %s366_s1, 512 }
  0x14   :  { %s28_s27 = sshll.u32 %s288_s26, 4  ;;  %p236_p8 = scmp.ne.s32.totalorder %s366_s1, %s235_s30  ;;  %s29_s27 = int_to_ptr.vmem [resolvable:$true] %s28_s27 }
  0x15   :  { %p239_p9 = scmp.lt.u32.totalorder %s235_s30, %s366_s1 }
  0x17   :  { %p241_p10 = pnand %p239_p9, %p236_p8 }
  0x19   :  { %244 = shalt.err (!%p241_p10)
}
  0x1a   :  { %s245_s8 = scalar_lea.vmem %s29_s27, 512  ;;  %p250_p12 = scmp.lt.s32.totalorder %s29_s27, %s29_s27 }
  0x1b   :  { %p246_p11 = scmp.ne.s32.totalorder %s29_s27, %s245_s8  ;;  %p251_p13 = scmp.lt.s32.totalorder %s245_s8, %s245_s8 }
  0x1d   :  { %p252_p0 = por %p251_p13, %p250_p12 }
  0x1f   :  { %p253_p1 = pnand %p252_p0, %p246_p11 }
  0x21   :  { %256 = shalt.err (!%p253_p1)
}
  0x22   :  { %34 = dma.hbm_to_vmem [thread:$0]  %s366_s1, 512, %s29_s27, [#allocation7], %s286_s22, %s286_s22, %s287_s23  }
  0x23   :  { %279 = dma.done.wait [#allocation4], 256  }
  0x24   :  { %280 = vsyncadd [#allocation4], 4294967040 }
  0x25   :  { %281 = dma.done.wait [#allocation7], 512  }
  0x26   :  { %282 = vsyncadd [#allocation7], 4294966784  ;;  %vm47_vm0 = vcmask 785408   ;;  %v289_v0 = vmov 0.0   ;;  %vm58_vm1 = vcmask 261120   ;;  %v54_v1 = vld [vmem:[#allocation6] sm:$0xff] }
  0x27   :  { %49 = vst.msk [vmem:[#allocation2 + $0x8] sm:$0xff] %vm47_vm0, %v289_v0  ;;  %48 = vst.msk [vmem:[#allocation2] sm:$0xff] %vm47_vm0, %v289_v0  ;;  %v55_v2 = vld [vmem:[#allocation6 + $0x8] sm:$0xff]  ;;  %v56_v3 = vld [vmem:[#allocation6 + $0x10] sm:$0xff]  ;;  %s290_s11 = smov [#allocation8]  }
  0x28   :  { %v199_v4 = vpack.c.bf16 %v55_v2, %v54_v1  ;;  %v57_v5 = vld [vmem:[#allocation6 + $0x18] sm:$0xff]  ;;  %v52_v6 = vld [vmem:[#allocation3] sm:$0xff]  ;;  %v181_v15 = vld [vmem:[%s367_s2] ss:$0 sm:$0xff]  ;;  %s166_s12 = sshll.u32 %s290_s11, 4  ;;  %s167_s12 = int_to_ptr.vmem [resolvable:$true] %s166_s12 }
  0x29   :  { %v203_v7 = vpack.c.bf16 %v57_v5, %v56_v3  ;;  %196 = vmatprep.mubr.msk.f32.mxu0 %vm58_vm1, %v52_v6  ;;  %v53_v8 = vld [vmem:[#allocation3 + $0x8] sm:$0xff]  ;;  %s257_s13 = scalar_lea.vmem %s167_s12, 256  ;;  %p262_p3 = scmp.lt.s32.totalorder %s167_s12, %s167_s12 }
  0x2a   :  { %200 = vmatprep.subr.bf16.mxu0 %v199_v4  ;;  %p258_p2 = scmp.ne.s32.totalorder %s167_s12, %s257_s13  ;;  %p263_p4 = scmp.lt.s32.totalorder %s257_s13, %s257_s13 }
  0x2b   :  { %202 = vmatpush3.bf16.msra.mxu0 %v199_v4 }
  0x2c   :  { %204 = vmatprep.subr.bf16.mxu0 %v203_v7  ;;  %p264_p5 = por %p263_p4, %p262_p3 }
  0x2e   :  { %v51_v9 = vld [vmem:[#allocation2 + $0x8] sm:$0xff]  ;;  %v50_v10 = vld [vmem:[#allocation2] sm:$0xff]  ;;  %p265_p6 = pnand %p264_p5, %p258_p2 }
  0x2f   :  { %206 = vmatpush3.bf16.msra.mxu0 %v203_v7 }
  0x32   :  { %197 = vmatmul.mubr.msk.f32.vlgmr.msra.gmra.mrb[0].mxu0 %vm58_vm1, %v53_v8 }
 0x105   :  { %v198_v11 = vpop.f32.mrb[0].mxu0 }
 0x106   :  { %v141_v12 = vadd.f32 %v198_v11, %v51_v9  ;;  %v131_v13 = vpop.f32.mrb[1].mxu0 }
 0x107   :  { %v140_v14 = vadd.f32 %v131_v13, %v50_v10 }
 0x108   :  { %144 = vst.msk [vmem:[#allocation2 + $0x8] sm:$0xff] %vm47_vm0, %v141_v12 }
 0x109   :  { %143 = vst.msk [vmem:[#allocation2] sm:$0xff] %vm47_vm0, %v140_v14 }
 0x10f   :  { %v149_v16 = vld [vmem:[#allocation2 + $0x8] sm:$0xff] }
 0x110   :  { %v148_v17 = vld [vmem:[#allocation2] sm:$0xff]  ;;  %v158_v18 = vadd.f32 %v181_v15, %v149_v16 }
 0x111   :  { %v157_v19 = vadd.f32 %v181_v15, %v148_v17 }
 0x112   :  { %160 = vst.msk [vmem:[#allocation8 + $0x8] sm:$0xff] %vm47_vm0, %v158_v18 }
 0x113   :  { %159 = vst.msk [vmem:[#allocation8] sm:$0xff] %vm47_vm0, %v157_v19 }
 0x114   :  { %268 = shalt.err (!%p265_p6)
}
 0x115   :  { %s269_s15 = scalar_lea.hbm %s368_s3, 256 }
 0x116   :  { %p270_p7 = scmp.ne.s32.totalorder %s368_s3, %s269_s15  ;;  %p273_p8 = scmp.lt.u32.totalorder %s269_s15, %s368_s3 }
 0x118   :  { %p275_p9 = pnand %p273_p8, %p270_p7 }
 0x11a   :  { %278 = shalt.err (!%p275_p9)
}
 0x11b   :  { %172 = dma.vmem_to_hbm [thread:$0]  %s167_s12, 256, %s368_s3, [#allocation5], %s286_s22, %s286_s22, %s287_s23  }
 0x11c   :  { %283 = dma.done.wait [#allocation5], 256  }
 0x11d   :  { %284 = vsyncadd [#allocation5], 4294967040 }
 0x11e   :  { %176 = vsyncpa [#allocation4], 1 }
 0x11f   :  { %177 = vsyncpa [#allocation7], 1 }
 0x120   :  { %178 = vsyncpa [#allocation5], 1 }

</bundles_post_ra>
